<compile_context>
chip_gen: v5e
topology: v5e:2x2
jax: 0.10.0
libtpu: 0.0.40
codegen_flags: <defaults>
</compile_context>

<pallas_src>
import functools
from typing import List, Tuple

import jax
import jax.numpy as jnp
from jax.experimental import pallas as pl
from jax.experimental.pallas import tpu as pltpu


LANE = 128      # lane width: pad hidden/output feature dims to this
SUBLANE = 8     # sublane: pad/align batch tiles to this


def _round_up(x: int, m: int) -> int:
    return (x + m - 1) // m * m


# ---------------------------------------------------------------------------
# Fused kernel.  refs = (x, w_0, ..., w_{n-1}, b_packed, out)
#   x        : bf16 (tm, Din)            -- true, un-padded layer-0 K
#   w_i      : bf16 (K_i, Npad_i)        -- VMEM-resident, single-buffered
#   b_packed : f32  (n_layers, max_Npad) -- VMEM-resident, single-buffered
#   out      : (tm, Npad_last)
# Intermediate activations never touch HBM; each layer's epilogue (bias add +
# optional ReLU + bf16 down-cast) is one fused elementwise pass.
# ---------------------------------------------------------------------------
def _fused_mlp_kernel(*refs, num_layers: int, relu_flags: Tuple[bool, ...],
                      dout_pads: Tuple[int, ...]):
    x_ref = refs[0]
    b_ref = refs[1 + num_layers]
    o_ref = refs[-1]

    h = x_ref[...]                                               # bf16
    for i in range(num_layers):
        w_ref = refs[1 + i]
        y = jnp.dot(h, w_ref[...], preferred_element_type=jnp.float32)  # MXU
        y = y + b_ref[i:i + 1, :dout_pads[i]]                    # f32 epilogue
        if relu_flags[i]:
            y = jnp.maximum(y, 0.0)
        if i + 1 < num_layers:
            h = y.astype(jnp.bfloat16)                           # fused down-cast
        else:
            o_ref[...] = y.astype(o_ref.dtype)


# ---------------------------------------------------------------------------
# Parameter init: orthogonal weights (nn.init.orthogonal_), zero bias.
# ---------------------------------------------------------------------------
def orthogonal_init(key, in_features: int, out_features: int):
    rows, cols = out_features, in_features
    a = jax.random.normal(key, (max(rows, cols), min(rows, cols)), dtype=jnp.float32)
    q, r = jnp.linalg.qr(a)
    d = jnp.sign(jnp.diag(r))
    q = q * d[None, :]
    w = q[:rows, :cols] if rows >= cols else q[:cols, :rows].T   # (out, in)
    return w


def init_mlp_params(key, fc_feat_dim_list: List[int]):
    n = len(fc_feat_dim_list) - 1
    weights_bf16, weights_f32, dout_pads = [], [], []
    for i in range(n):
        key, sub = jax.random.split(key)
        din, dout = fc_feat_dim_list[i], fc_feat_dim_list[i + 1]
        w_torch = orthogonal_init(sub, din, dout)        # (out, in) PyTorch layout
        w = w_torch.T                                    # (in, out): y = x @ w + b
        # Layer 0 keeps its true K (no host-side over-pad); later layers' K must
        # match the previous layer's padded output width (padded lanes are 0).
        k_p = din if i == 0 else _round_up(din, LANE)
        n_p = _round_up(dout, LANE)
        w_pad = jnp.zeros((k_p, n_p), jnp.float32).at[:din, :dout].set(w)
        weights_bf16.append(w_pad.astype(jnp.bfloat16))
        weights_f32.append(w)                            # unpadded f32 (reference)
        dout_pads.append(n_p)
    # All biases packed into one resident (n, max_Npad) f32 table (zeros per
    # nn.init.zeros_): one BlockSpec / DMA / buffer instead of one per layer.
    bias_packed = jnp.zeros((n, max(dout_pads)), jnp.float32)
    return {
        "weights": tuple(weights_bf16),
        "bias_packed": bias_packed,
        "weights_f32": weights_f32,
        "dims": tuple(fc_feat_dim_list),
        "dout_pads": tuple(dout_pads),
    }


# ---------------------------------------------------------------------------
# Forward: one fused pallas_call over a batch grid, fully under jax.jit.
# ---------------------------------------------------------------------------
@functools.partial(
    jax.jit,
    static_argnames=("dims", "dout_pads", "relu_flags", "tile_m", "out_dtype"))
def _mlp_forward_impl(x, weights, bias_packed, *, dims, dout_pads, relu_flags,
                      tile_m, out_dtype):
    n = len(weights)
    B, Din = x.shape
    assert Din == dims[0]
    dout_p_last = dout_pads[-1]

    # --- batch tiling: minimal sublane padding, no round-up-to-tile cliff ----
    B_p0 = _round_up(max(B, SUBLANE), SUBLANE)
    grid_m = pl.cdiv(B_p0, max(tile_m, SUBLANE))
    if B_p0 >= 2 * SUBLANE:
        grid_m = max(grid_m, 2)            # keep both v7x TensorCores busy
    tm = _round_up(pl.cdiv(B_p0, grid_m), SUBLANE)
    B_p = grid_m * tm                      # pads at most grid_m*(SUBLANE-1) rows

    # bf16 input stream; feature dim keeps its true width (full-array block).
    x_pad = jnp.pad(x.astype(jnp.bfloat16), ((0, B_p - B), (0, 0)))

    kernel = functools.partial(_fused_mlp_kernel, num_layers=n,
                               relu_flags=relu_flags, dout_pads=dout_pads)

    in_specs = [pl.BlockSpec((tm, Din), lambda i: (i, 0))]
    for w in weights:
        in_specs.append(pl.BlockSpec(w.shape, lambda i: (0, 0),
                                     pipeline_mode=pl.Buffered(1)))
    in_specs.append(pl.BlockSpec(bias_packed.shape, lambda i: (0, 0),
                                 pipeline_mode=pl.Buffered(1)))

    out_itemsize = jnp.dtype(out_dtype).itemsize
    flops = 2 * B_p * sum(int(w.shape[0]) * int(w.shape[1]) for w in weights)
    bytes_accessed = (int(x_pad.size) * 2
                      + sum(int(w.size) * 2 for w in weights)
                      + int(bias_packed.size) * 4
                      + B_p * dout_p_last * out_itemsize)

    # Explicit VMEM budget: single-buffered residents + double-buffered x/out
    # streams + per-layer f32 intermediates, plus headroom.
    bytes_resident = (sum(int(w.size) * 2 for w in weights)
                      + int(bias_packed.size) * 4)
    bytes_stream = 2 * tm * Din * 2 + 2 * tm * dout_p_last * out_itemsize
    bytes_inter = 2 * tm * max(dout_pads) * 4
    vmem_limit = bytes_resident + bytes_stream + bytes_inter + (8 << 20)
    vmem_limit = int(min(max(vmem_limit, 32 << 20), 128 << 20))

    out_pad = pl.pallas_call(
        kernel,
        out_shape=jax.ShapeDtypeStruct((B_p, dout_p_last), out_dtype),
        grid=(grid_m,),
        in_specs=in_specs,
        out_specs=pl.BlockSpec((tm, dout_p_last), lambda i: (i, 0)),
        compiler_params=pltpu.CompilerParams(
            dimension_semantics=("parallel",),
            vmem_limit_bytes=vmem_limit,
        ),
        cost_estimate=pl.CostEstimate(
            flops=flops, transcendentals=0, bytes_accessed=bytes_accessed),
    )(x_pad, *weights, bias_packed)

    # Padded rows / lanes are sliced off here (padded rows contain bias garbage).
    return out_pad[:B, :dims[-1]]


def mlp_forward(params, x, non_linearity_last: bool = False, tile_m: int = 256,
                out_dtype=jnp.float32):
    n = len(params["weights"])
    relu_flags = tuple((i + 1 < n) or non_linearity_last for i in range(n))
    return _mlp_forward_impl(
        x, params["weights"], params["bias_packed"],
        dims=params["dims"], dout_pads=params["dout_pads"],
        relu_flags=relu_flags, tile_m=tile_m, out_dtype=out_dtype)


if __name__ == "__main__":
    key = jax.random.PRNGKey(0)

    # Small shapes consistent with the module: MLP([32, 64, 32, 16], "test")
    fc_feat_dim_list = [32, 64, 32, 16]
    batch = 8

    pkey, xkey = jax.random.split(key)
    params = init_mlp_params(pkey, fc_feat_dim_list)
    x = jax.random.normal(xkey, (batch, fc_feat_dim_list[0]), dtype=jnp.float32)

    out = mlp_forward(params, x, non_linearity_last=False)
    out = jax.block_until_ready(out)

    # Pure-f32 reference with original-module semantics (bias == 0).  The kernel
    # uses bf16 MXU operands with f32 accumulation, hence the loosened tolerance.
    ref = x
    nlayers = len(params["weights_f32"])
    for i, w in enumerate(params["weights_f32"]):
        ref = ref @ w
        if i + 1 < nlayers:
            ref = jnp.maximum(ref, 0.0)

    assert out.shape == (batch, fc_feat_dim_list[-1])
    err = float(jnp.max(jnp.abs(out - ref)))
    assert jnp.allclose(out, ref, atol=5e-2, rtol=5e-2), err

    print("KERNEL_OK")
</pallas_src>

<mosaic_0001>
module attributes {stable_mosaic.version = 11 : i64} {
  func.func @_fused_mlp_kernel(%arg0: i32, %arg1: memref<8x32xbf16, #tpu.memory_space<vmem>>, %arg2: memref<32x128xbf16, #tpu.memory_space<vmem>>, %arg3: memref<128x128xbf16, #tpu.memory_space<vmem>>, %arg4: memref<128x128xbf16, #tpu.memory_space<vmem>>, %arg5: memref<3x128xf32, #tpu.memory_space<vmem>>, %arg6: memref<8x128xf32, #tpu.memory_space<vmem>>) attributes {dimension_semantics = [#tpu.dimension_semantics<parallel>], iteration_bounds = array<i64: 1>, scalar_prefetch = 0 : i64, scratch_operands = 0 : i64, tpu.core_type = #tpu.core_type<tc>, window_params = [{transform_indices = @transform_0, window_bounds = array<i64: 8, 32>}, {pipeline_mode = #tpu.pipeline_mode<synchronous>, transform_indices = @transform_1, window_bounds = array<i64: 32, 128>}, {pipeline_mode = #tpu.pipeline_mode<synchronous>, transform_indices = @transform_2, window_bounds = array<i64: 128, 128>}, {pipeline_mode = #tpu.pipeline_mode<synchronous>, transform_indices = @transform_3, window_bounds = array<i64: 128, 128>}, {pipeline_mode = #tpu.pipeline_mode<synchronous>, transform_indices = @transform_4, window_bounds = array<i64: 3, 128>}, {transform_indices = @transform_5, window_bounds = array<i64: 8, 128>}]} {
    %c0 = arith.constant 0 : index
    %c0_0 = arith.constant 0 : index
    %0 = vector.load %arg1[%c0, %c0_0] : memref<8x32xbf16, #tpu.memory_space<vmem>>, vector<8x32xbf16>
    %c0_1 = arith.constant 0 : index
    %c0_2 = arith.constant 0 : index
    %1 = vector.load %arg2[%c0_1, %c0_2] : memref<32x128xbf16, #tpu.memory_space<vmem>>, vector<32x128xbf16>
    %cst = arith.constant dense<0.000000e+00> : vector<8x128xf32>
    %2 = tpu.matmul %0, %1, %cst {dimension_numbers = #tpu.dot_dimension_numbers<[1], [0], [0], [1], [0, 0, 1, 1], [], []>} : vector<8x32xbf16>, vector<32x128xbf16>, vector<8x128xf32> -> vector<8x128xf32>
    %c0_3 = arith.constant 0 : index
    %c0_4 = arith.constant 0 : index
    %3 = vector.load %arg5[%c0_3, %c0_4] : memref<3x128xf32, #tpu.memory_space<vmem>>, vector<1x128xf32>
    %4 = vector.broadcast %3 : vector<1x128xf32> to vector<8x128xf32>
    %5 = arith.addf %2, %4 : vector<8x128xf32>
    %cst_5 = arith.constant 0.000000e+00 : f32
    %6 = vector.broadcast %cst_5 : f32 to vector<8x128xf32>
    %7 = arith.maximumf %5, %6 : vector<8x128xf32>
    %8 = arith.truncf %7 : vector<8x128xf32> to vector<8x128xbf16>
    %c0_6 = arith.constant 0 : index
    %c0_7 = arith.constant 0 : index
    %9 = vector.load %arg3[%c0_6, %c0_7] : memref<128x128xbf16, #tpu.memory_space<vmem>>, vector<128x128xbf16>
    %cst_8 = arith.constant dense<0.000000e+00> : vector<8x128xf32>
    %10 = tpu.matmul %8, %9, %cst_8 {dimension_numbers = #tpu.dot_dimension_numbers<[1], [0], [0], [1], [0, 0, 1, 1], [], []>} : vector<8x128xbf16>, vector<128x128xbf16>, vector<8x128xf32> -> vector<8x128xf32>
    %c1 = arith.constant 1 : index
    %c0_9 = arith.constant 0 : index
    %11 = vector.load %arg5[%c1, %c0_9] : memref<3x128xf32, #tpu.memory_space<vmem>>, vector<1x128xf32>
    %12 = vector.broadcast %11 : vector<1x128xf32> to vector<8x128xf32>
    %13 = arith.addf %10, %12 : vector<8x128xf32>
    %cst_10 = arith.constant 0.000000e+00 : f32
    %14 = vector.broadcast %cst_10 : f32 to vector<8x128xf32>
    %15 = arith.maximumf %13, %14 : vector<8x128xf32>
    %16 = arith.truncf %15 : vector<8x128xf32> to vector<8x128xbf16>
    %c0_11 = arith.constant 0 : index
    %c0_12 = arith.constant 0 : index
    %17 = vector.load %arg4[%c0_11, %c0_12] : memref<128x128xbf16, #tpu.memory_space<vmem>>, vector<128x128xbf16>
    %cst_13 = arith.constant dense<0.000000e+00> : vector<8x128xf32>
    %18 = tpu.matmul %16, %17, %cst_13 {dimension_numbers = #tpu.dot_dimension_numbers<[1], [0], [0], [1], [0, 0, 1, 1], [], []>} : vector<8x128xbf16>, vector<128x128xbf16>, vector<8x128xf32> -> vector<8x128xf32>
    %c2 = arith.constant 2 : index
    %c0_14 = arith.constant 0 : index
    %19 = vector.load %arg5[%c2, %c0_14] : memref<3x128xf32, #tpu.memory_space<vmem>>, vector<1x128xf32>
    %20 = vector.broadcast %19 : vector<1x128xf32> to vector<8x128xf32>
    %21 = arith.addf %18, %20 : vector<8x128xf32>
    %c0_15 = arith.constant 0 : index
    %c0_16 = arith.constant 0 : index
    %22 = vector.load %arg6[%c0_15, %c0_16] : memref<8x128xf32, #tpu.memory_space<vmem>>, vector<8x128xf32>
    tpu.vector_store %arg6[%c0_15, %c0_16], %21 {strides = array<i32>} : memref<8x128xf32, #tpu.memory_space<vmem>>, vector<8x128xf32>,
    return
  }
  func.func @transform_0(%arg0: i32) -> (i32, i32) {
    %c0_i32 = arith.constant 0 : i32
    %c0_i32_0 = arith.constant 0 : i32
    return %arg0, %c0_i32 : i32, i32
  }
  func.func @transform_1(%arg0: i32) -> (i32, i32) {
    %c0_i32 = arith.constant 0 : i32
    %c0_i32_0 = arith.constant 0 : i32
    %c0_i32_1 = arith.constant 0 : i32
    return %c0_i32, %c0_i32_0 : i32, i32
  }
  func.func @transform_2(%arg0: i32) -> (i32, i32) {
    %c0_i32 = arith.constant 0 : i32
    %c0_i32_0 = arith.constant 0 : i32
    %c0_i32_1 = arith.constant 0 : i32
    return %c0_i32, %c0_i32_0 : i32, i32
  }
  func.func @transform_3(%arg0: i32) -> (i32, i32) {
    %c0_i32 = arith.constant 0 : i32
    %c0_i32_0 = arith.constant 0 : i32
    %c0_i32_1 = arith.constant 0 : i32
    return %c0_i32, %c0_i32_0 : i32, i32
  }
  func.func @transform_4(%arg0: i32) -> (i32, i32) {
    %c0_i32 = arith.constant 0 : i32
    %c0_i32_0 = arith.constant 0 : i32
    %c0_i32_1 = arith.constant 0 : i32
    return %c0_i32, %c0_i32_0 : i32, i32
  }
  func.func @transform_5(%arg0: i32) -> (i32, i32) {
    %c0_i32 = arith.constant 0 : i32
    %c0_i32_0 = arith.constant 0 : i32
    return %arg0, %c0_i32 : i32, i32
  }
}

</mosaic_0001>

<bundles_post_ra>
// kernel: _mlp_forward_impl.1
= control target key start
LH: loop header
LB: loop body
LE: loop exit
PB: predicated region body
PF: predicated region fallthrough
CT: control target
= control target key end

     0   :  { %10 = vsyncpa [#allocation3], 0  ;;  %s548_s0 = inlined_call_operand.vmem [shape: bf16[8,32], index: 0, kind: input, shape index: {}]   ;;  %s549_s1 = inlined_call_operand.hbm [shape: bf16[32,128], index: 1, kind: input, shape index: {}]   ;;  %s550_s2 = inlined_call_operand.hbm [shape: bf16[128,128], index: 2, kind: input, shape index: {}]   ;;  %s551_s3 = inlined_call_operand.hbm [shape: bf16[128,128], index: 3, kind: input, shape index: {}]   ;;  %s552_s4 = inlined_call_operand.vmem [shape: f32[3,128], index: 4, kind: input, shape index: {}]   ;;  %s553_s5 = inlined_call_operand.hbm [shape: f32[8,128], index: 5, kind: output, shape index: {}]  }
   0x1   :  { %11 = vsyncpa [#allocation6], 0 }
   0x2   :  { %12 = vsyncpa [#allocation4], 0  ;;  %s32_s20 = sshll.u32 %s550_s2, 4  ;;  %s488_s21 = smov [#allocation5]   ;;  %s33_s20 = int_to_ptr.hbm [resolvable:$true] %s32_s20 }
   0x3   :  { %s34_s22 = sshll.u32 %s488_s21, 4  ;;  %s19_s25 = sshll.u32 %s549_s1, 4  ;;  %s35_s22 = int_to_ptr.vmem [resolvable:$true] %s34_s22  ;;  %s20_s25 = int_to_ptr.hbm [resolvable:$true] %s19_s25 }
   0x4   :  { %s489_s26 = smov 64   ;;  %s490_s27 = smov 4  }
   0x5   :  { %40 = dma.hbm_to_vmem [thread:$0]  %s33_s20, 1024, %s35_s22, [#allocation6], %s489_s26, %s489_s26, %s490_s27  }
   0x6   :  { %s491_s28 = smov [#allocation2]   ;;  %s45_s7 = sshll.u32 %s551_s3, 4  ;;  %s46_s7 = int_to_ptr.hbm [resolvable:$true] %s45_s7 }
   0x7   :  { %s21_s29 = sshll.u32 %s491_s28, 4  ;;  %s492_s2 = smov [#allocation7]   ;;  %s22_s29 = int_to_ptr.vmem [resolvable:$true] %s21_s29 }
   0x8   :  { %27 = dma.hbm_to_vmem [thread:$0]  %s20_s25, 256, %s22_s29, [#allocation3], %s489_s26, %s489_s26, %s490_s27  }
   0x9   :  { %s47_s8 = sshll.u32 %s492_s2, 4  ;;  %s48_s8 = int_to_ptr.vmem [resolvable:$true] %s47_s8 }
   0xa   :  { %53 = dma.hbm_to_vmem [thread:$0]  %s46_s7, 1024, %s48_s8, [#allocation6], %s489_s26, %s489_s26, %s490_s27  }
   0xb   :  { %482 = dma.done.wait [#allocation3], 256  }
   0xc   :  { %483 = vsyncadd [#allocation3], 4294967040 }
   0xd   :  { %484 = dma.done.wait [#allocation6], 2048  }
   0xe   :  { %485 = vsyncadd [#allocation6], 4294965248  ;;  %v360_v0 = vld [vmem:[#allocation2 + $0x8] sm:$0xff]  ;;  %v359_v2 = vld [vmem:[#allocation2] sm:$0xff]  ;;  %vm88_vm0 = vcmask 261120   ;;  %s493_s14 = smov [#allocation8]  }
   0xf   :  { %v368_v1 = vld [vmem:[#allocation5 + $0x38] sm:$0xff]  ;;  %98 = vmatpush.bf16.msra.mxu0 %v360_v0  ;;  %v367_v3 = vld [vmem:[#allocation5 + $0x30] sm:$0xff]  ;;  %v366_v5 = vld [vmem:[#allocation5 + $0x28] sm:$0xff]  ;;  %s273_s15 = sshll.u32 %s493_s14, 4  ;;  %s275_s18 = sshll.u32 %s553_s5, 4  ;;  %s274_s15 = int_to_ptr.vmem [resolvable:$true] %s273_s15  ;;  %s276_s18 = int_to_ptr.hbm [resolvable:$true] %s275_s18 }
  0x10   :  { %173 = vmatpush.bf16.msra.mxu1 %v368_v1  ;;  %v69_v4 = vld [vmem:[%s548_s0] sm:$0xf]  ;;  %v365_v6 = vld [vmem:[#allocation5 + $0x20] sm:$0xff]  ;;  %v364_v7 = vld [vmem:[#allocation5 + $0x18] sm:$0xff] }
  0x11   :  { %v363_v8 = vld [vmem:[#allocation5 + $0x10] sm:$0xff]  ;;  %v362_v9 = vld [vmem:[#allocation5 + $0x8] sm:$0xff]  ;;  %v361_v10 = vld [vmem:[#allocation5] sm:$0xff] }
  0x12   :  { %v376_v11 = vld [vmem:[#allocation7 + $0x38] sm:$0xff]  ;;  %v375_v12 = vld [vmem:[#allocation7 + $0x30] sm:$0xff]  ;;  %v374_v13 = vld [vmem:[#allocation7 + $0x28] sm:$0xff] }
  0x13   :  { %99 = vmatpush.bf16.msra.mxu0 %v359_v2  ;;  %254 = vmatpush.bf16.msra.mxu2 %v376_v11  ;;  %v373_v14 = vld [vmem:[#allocation7 + $0x20] sm:$0xff]  ;;  %v372_v15 = vld [vmem:[#allocation7 + $0x18] sm:$0xff]  ;;  %v371_v16 = vld [vmem:[#allocation7 + $0x10] sm:$0xff] }
  0x14   :  { %174 = vmatpush.bf16.msra.mxu1 %v367_v3  ;;  %v383_v17 = vld [vmem:[%s552_s4] ss:$0 sm:$0xff]  ;;  %v370_v23 = vld [vmem:[#allocation7 + $0x8] sm:$0xff]  ;;  %v369_v24 = vld [vmem:[#allocation7] sm:$0xff] }
  0x15   :  { %v384_v25 = vld [vmem:[%s552_s4 + $0x1] ss:$0 sm:$0xff]  ;;  %v385_v31 = vld [vmem:[%s552_s4 + $0x2] ss:$0 sm:$0xff] }
  0x16   :  { %294 = vmatmul.msk.bf16.vlgmr.msra.gmra.mxu0 %vm88_vm0, %v69_v4 }
  0x17   :  { %255 = vmatpush.bf16.msra.mxu2 %v375_v12 }
  0x18   :  { %175 = vmatpush.bf16.msra.mxu1 %v366_v5 }
  0x1b   :  { %256 = vmatpush.bf16.msra.mxu2 %v374_v13 }
  0x1c   :  { %176 = vmatpush.bf16.msra.mxu1 %v365_v6 }
  0x1f   :  { %257 = vmatpush.bf16.msra.mxu2 %v373_v14 }
  0x20   :  { %177 = vmatpush.bf16.msra.mxu1 %v364_v7 }
  0x23   :  { %258 = vmatpush.bf16.msra.mxu2 %v372_v15 }
  0x24   :  { %178 = vmatpush.bf16.msra.mxu1 %v363_v8 }
  0x27   :  { %259 = vmatpush.bf16.msra.mxu2 %v371_v16 }
  0x28   :  { %179 = vmatpush.bf16.msra.mxu1 %v362_v9 }
  0x2b   :  { %260 = vmatpush.bf16.msra.mxu2 %v370_v23 }
  0x2c   :  { %180 = vmatpush.bf16.msra.mxu1 %v361_v10 }
  0x2f   :  { %261 = vmatpush.bf16.msra.mxu2 %v369_v24 }
  0x93   :  { %v101_v18 = vpop.f32.mrf.mxu0 }
  0x94   :  { %v102_v19 = vadd.f32 %v383_v17, %v101_v18 }
  0x96   :  { %v105_v20 = vmax.f32 %v102_v19, 0.0 }
  0x98   :  { %v106_v21 = vpack.c.bf16 %v105_v20, %v105_v20 }
  0x9a   :  { %181 = vmatmul.bf16.vlgmr.msra.gmra.mxu1 %v106_v21 }
  0x9b   :  { %v103_v22 = vpop.f32.mrf.mxu0 }
 0x117   :  { %v182_v26 = vpop.f32.mrf.mxu1 }
 0x118   :  { %v183_v27 = vadd.f32 %v384_v25, %v182_v26 }
 0x11a   :  { %v186_v28 = vmax.f32 %v183_v27, 0.0 }
 0x11c   :  { %v187_v29 = vpack.c.bf16 %v186_v28, %v186_v28 }
 0x11e   :  { %262 = vmatmul.bf16.vlgmr.msra.gmra.mxu2 %v187_v29 }
 0x11f   :  { %v184_v30 = vpop.f32.mrf.mxu1 }
 0x1a1   :  { %v263_v32 = vpop.f32.mrf.mxu2 }
 0x1a2   :  { %v264_v33 = vadd.f32 %v385_v31, %v263_v32 }
 0x1a4   :  { %267 = vst [vmem:[#allocation8] sm:$0xff] %v264_v33 }
 0x1a5   :  { %278 = dma.vmem_to_hbm [thread:$0]  %s274_s15, 128, %s276_s18, [#allocation4]  }
 0x1a9   :  { %v265_v34 = vpop.f32.mrf.mxu2 }
 0x1aa   :  { %486 = dma.done.wait [#allocation4], 128  }
 0x1ab   :  { %487 = vsyncadd [#allocation4], 4294967168 }
 0x1ac   :  { %283 = vsyncpa [#allocation3], 1 }
 0x1ad   :  { %284 = vsyncpa [#allocation6], 1 }
 0x1ae   :  { %285 = vsyncpa [#allocation4], 1 }

</bundles_post_ra>
